<compile_context>
chip_gen: v7x
topology: tpu7x:2x2x1
jax: 0.10.0
libtpu: 0.0.40
codegen_flags: <defaults>
</compile_context>

<pallas_src>
import functools

import jax
import jax.numpy as jnp
from jax.experimental import pallas as pl
from jax.experimental.pallas import tpu as pltpu


def _round_up(x, m):
    return ((x + m - 1) // m) * m


# ---------------------------------------------------------------------------
# Kernel
# ---------------------------------------------------------------------------
def _dueling_kernel(layer_dims, action_size, x_ref, w_ref, b_ref, out_ref):
    """One grid step: a (TB, S) f32 batch tile -> (TB, A) f32 Q-values.

    layer_dims: static tuple of (in_dim, out_dim) per packed layer; the fused
    head's final layer has out_dim == action_size + 1 with lane layout
    [advantage ... | value].
    """
    h = x_ref[...]                                    # (TB, S) f32
    for l, (kin, kout) in enumerate(layer_dims):
        w = w_ref[l][:kin, :kout]                     # aligned block load, value slice (bf16)
        b = b_ref[l][:, :kout]                        # (1, kout) f32
        # bf16 operands -> MXU at full rate; accumulate + bias + ReLU in f32
        # (v5e's VPU has no bf16, so keep the epilogue math in f32).
        y = jnp.dot(h.astype(jnp.bfloat16), w,
                    preferred_element_type=jnp.float32) + b
        h = jnp.maximum(y, 0.0)

    # h: (TB, A + 1) f32 -- lanes [0, A) are advantages, lane A is the value.
    a = h[:, :action_size]
    v = h[:, action_size:action_size + 1]
    a_mean = jnp.sum(a, axis=1, keepdims=True) * (1.0 / action_size)
    out_ref[...] = (v + a - a_mean).astype(out_ref.dtype)   # single fused store


# ---------------------------------------------------------------------------
# One-time parameter preparation (NOT on the per-call path)
# ---------------------------------------------------------------------------
def _fuse_branches(a_params, v_params):
    """Pack the advantage/value heads so each depth is ONE matmul.

    Depth 0: both heads read the same shared features -> concat along out dim.
    Depth >0: the heads have diverged -> block-diagonal weight keeps them
    independent while still using a single MXU pass.
    Lane layout of the fused activations: [advantage ... | value].
    """
    assert len(a_params) == len(v_params), (
        "branch fusion requires equal-depth value/advantage heads")
    fused = []
    for d, ((wa, ba), (wv, bv)) in enumerate(zip(a_params, v_params)):
        if d == 0:
            w = jnp.concatenate([wa, wv], axis=1)
        else:
            za = jnp.zeros((wa.shape[0], wv.shape[1]), wa.dtype)
            zv = jnp.zeros((wv.shape[0], wa.shape[1]), wv.dtype)
            w = jnp.block([[wa, za], [zv, wv]])
        b = jnp.concatenate([ba, bv], axis=1)
        fused.append((w, b))
    return fused


def prepare_params(base_params, v_params, a_params):
    """Fuse, cast and pack all layers into two grid-invariant slabs.

    Returns (w_slab bf16 (L, K_pad, N_pad), b_slab f32 (L, 1, N_pad),
    layer_dims tuple of (in_dim, out_dim)).  Zero padding is inert: the kernel
    slices each layer back to its true dims before the matmul.
    """
    layers = list(base_params) + _fuse_branches(a_params, v_params)
    layer_dims = tuple((int(w.shape[0]), int(w.shape[1])) for w, _ in layers)
    k_pad = _round_up(max(k for k, _ in layer_dims), 8)
    n_pad = _round_up(max(n for _, n in layer_dims), 128)
    w_slab = jnp.stack([
        jnp.pad(w.astype(jnp.bfloat16),
                ((0, k_pad - w.shape[0]), (0, n_pad - w.shape[1])))
        for w, _ in layers])
    b_slab = jnp.stack([
        jnp.pad(b.astype(jnp.float32), ((0, 0), (0, n_pad - b.shape[1])))
        for _, b in layers])
    return w_slab, b_slab, layer_dims


# ---------------------------------------------------------------------------
# Per-call wrapper
# ---------------------------------------------------------------------------
def _choose_tb(batch):
    """Large tiles to amortize the ~0.35 us/step grid overhead (and feed >=256
    MXU rows on v6e/v7x), but keep >= 2 grid steps so v7x's two TensorCores
    both get work, and divide the batch exactly whenever possible so the
    pad + slice copies are skipped."""
    if batch < 16 or batch % 16 != 0:
        return batch                                   # one full-batch tile, no padding
    return min(_round_up(pl.cdiv(batch, 2), 8), 512)


def dueling_q_forward(x, w_slab, b_slab, layer_dims, action_size, *, tb=None):
    """x: (batch, state_size) f32.  w_slab/b_slab/layer_dims from prepare_params."""
    batch, state_size = x.shape
    assert layer_dims[0][0] == state_size
    assert layer_dims[-1][1] == action_size + 1

    if tb is None:
        tb = _choose_tb(batch)
    nb = pl.cdiv(batch, tb)
    b_pad = nb * tb
    x_in = x if b_pad == batch else jnp.pad(x, ((0, b_pad - batch), (0, 0)))

    kernel = functools.partial(_dueling_kernel, layer_dims, action_size)

    out = pl.pallas_call(
        kernel,
        out_shape=jax.ShapeDtypeStruct((b_pad, action_size), jnp.float32),
        grid=(nb,),
        in_specs=[
            pl.BlockSpec((tb, state_size), lambda i: (i, 0)),     # batch-tiled x (f32)
            pl.BlockSpec(w_slab.shape, lambda i: (0, 0, 0)),      # resident weight slab
            pl.BlockSpec(b_slab.shape, lambda i: (0, 0, 0)),      # resident bias slab
        ],
        out_specs=pl.BlockSpec((tb, action_size), lambda i: (i, 0)),
        compiler_params=pltpu.CompilerParams(
            dimension_semantics=("parallel",),          # shards steps across v7x's 2 TCs
            vmem_limit_bytes=32 * 1024 * 1024),         # at/near scoped default; tiny footprint
    )(x_in, w_slab, b_slab)

    return out if b_pad == batch else out[:batch]


# ---------------------------------------------------------------------------
# Parameter construction + plain-JAX reference
# ---------------------------------------------------------------------------
def _init_linear(key, fan_in, fan_out):
    """Deterministic PyTorch-style uniform init; stored as (in, out) + (1, out)."""
    kw, kb = jax.random.split(key)
    bound = 1.0 / (fan_in ** 0.5)
    w = jax.random.uniform(kw, (fan_in, fan_out), jnp.float32, -bound, bound)
    b = jax.random.uniform(kb, (1, fan_out), jnp.float32, -bound, bound)
    return w, b


def build_params(key, state_size, action_size, hidden_size):
    assert len(hidden_size) == 3
    base_dims = (state_size,) + hidden_size[0]
    v_dims = (base_dims[-1],) + hidden_size[1] + (1,)
    a_dims = (base_dims[-1],) + hidden_size[2] + (action_size,)

    def make(dims, key):
        params = []
        for i in range(len(dims) - 1):
            key, sub = jax.random.split(key)
            params.append(_init_linear(sub, dims[i], dims[i + 1]))
        return params, key

    base_params, key = make(base_dims, key)
    v_params, key = make(v_dims, key)
    a_params, key = make(a_dims, key)
    return base_params, v_params, a_params


def reference_forward(x, base_params, v_params, a_params, compute_dtype=jnp.float32):
    """Plain-JAX reference mirroring the PyTorch forward.

    compute_dtype=bf16 mirrors the kernel's bf16 operands / f32 accumulation.
    """
    def lin(h, w, b):
        y = jnp.dot(h.astype(compute_dtype), w.astype(compute_dtype),
                    preferred_element_type=jnp.float32) + b
        return jnp.maximum(y, 0.0)

    h = x
    for w, b in base_params:
        h = lin(h, w, b)
    v = h
    for w, b in v_params:
        v = lin(v, w, b)
    a = h
    for w, b in a_params:
        a = lin(a, w, b)
    return v + a - jnp.mean(a, axis=1, keepdims=True)


if __name__ == "__main__":
    state_size = 16
    action_size = 4
    hidden_size = ((32, 32), (32,), (32,))   # base / value branch / advantage branch
    batch = 256                               # auto tile -> tb=128, grid of 2 (both v7x TCs)

    key = jax.random.PRNGKey(0)
    key, xkey = jax.random.split(key)
    x = jax.random.normal(xkey, (batch, state_size), jnp.float32)

    base_params, v_params, a_params = build_params(
        key, state_size, action_size, hidden_size)

    # One-time prep (fusion, casts, slab packing) -- NOT on the per-call path.
    w_slab, b_slab, layer_dims = prepare_params(base_params, v_params, a_params)
    w_slab, b_slab = jax.block_until_ready((w_slab, b_slab))

    q = dueling_q_forward(x, w_slab, b_slab, layer_dims, action_size)
    q = jax.block_until_ready(q)
    assert q.shape == (batch, action_size)

    # Reference with the same bf16 operand casts as the kernel -> tight tolerance.
    q_ref_bf16 = reference_forward(x, base_params, v_params, a_params,
                                   compute_dtype=jnp.bfloat16)
    assert jnp.allclose(q, q_ref_bf16, atol=2e-3, rtol=2e-3), (
        float(jnp.max(jnp.abs(q - q_ref_bf16))))

    # Pure-f32 PyTorch-semantics reference -> loose tolerance (bf16 weights/activations).
    q_ref_f32 = reference_forward(x, base_params, v_params, a_params,
                                  compute_dtype=jnp.float32)
    assert jnp.allclose(q, q_ref_f32, atol=5e-2, rtol=5e-2), (
        float(jnp.max(jnp.abs(q - q_ref_f32))))

    print("KERNEL_OK")
</pallas_src>

<mosaic_0001>
module attributes {stable_mosaic.version = 11 : i64} {
  func.func @_dueling_kernel(%arg0: i32, %arg1: memref<128x16xf32, #tpu.memory_space<vmem>>, %arg2: memref<4x64x128xbf16, #tpu.memory_space<vmem>>, %arg3: memref<4x1x128xf32, #tpu.memory_space<vmem>>, %arg4: memref<128x4xf32, #tpu.memory_space<vmem>>) attributes {dimension_semantics = [#tpu.dimension_semantics<parallel>], iteration_bounds = array<i64: 2>, scalar_prefetch = 0 : i64, scratch_operands = 0 : i64, tpu.core_type = #tpu.core_type<tc>, window_params = [{transform_indices = @transform_0, window_bounds = array<i64: 128, 16>}, {pipeline_mode = #tpu.pipeline_mode<synchronous>, transform_indices = @transform_1, window_bounds = array<i64: 4, 64, 128>}, {pipeline_mode = #tpu.pipeline_mode<synchronous>, transform_indices = @transform_2, window_bounds = array<i64: 4, 1, 128>}, {transform_indices = @transform_3, window_bounds = array<i64: 128, 4>}]} {
    %c0 = arith.constant 0 : index
    %c0_0 = arith.constant 0 : index
    %0 = vector.load %arg1[%c0, %c0_0] : memref<128x16xf32, #tpu.memory_space<vmem>>, vector<128x16xf32>
    %c0_1 = arith.constant 0 : index
    %c0_2 = arith.constant 0 : index
    %c0_3 = arith.constant 0 : index
    %1 = vector.load %arg2[%c0_1, %c0_2, %c0_3] : memref<4x64x128xbf16, #tpu.memory_space<vmem>>, vector<1x64x128xbf16>
    %2 = vector.shape_cast %1 : vector<1x64x128xbf16> to vector<64x128xbf16>
    %3 = vector.extract_strided_slice %2 {offsets = [0, 0], sizes = [16, 32], strides = [1, 1]} : vector<64x128xbf16> to vector<16x32xbf16>
    %c0_4 = arith.constant 0 : index
    %c0_5 = arith.constant 0 : index
    %c0_6 = arith.constant 0 : index
    %4 = vector.load %arg3[%c0_4, %c0_5, %c0_6] : memref<4x1x128xf32, #tpu.memory_space<vmem>>, vector<1x1x128xf32>
    %5 = vector.shape_cast %4 : vector<1x1x128xf32> to vector<1x128xf32>
    %6 = vector.extract_strided_slice %5 {offsets = [0, 0], sizes = [1, 32], strides = [1, 1]} : vector<1x128xf32> to vector<1x32xf32>
    %7 = arith.truncf %0 : vector<128x16xf32> to vector<128x16xbf16>
    %cst = arith.constant dense<0.000000e+00> : vector<128x32xf32>
    %8 = tpu.matmul %7, %3, %cst {dimension_numbers = #tpu.dot_dimension_numbers<[1], [0], [0], [1], [0, 0, 1, 1], [], []>} : vector<128x16xbf16>, vector<16x32xbf16>, vector<128x32xf32> -> vector<128x32xf32>
    %9 = vector.broadcast %6 : vector<1x32xf32> to vector<128x32xf32>
    %10 = arith.addf %8, %9 : vector<128x32xf32>
    %cst_7 = arith.constant 0.000000e+00 : f32
    %11 = vector.broadcast %cst_7 : f32 to vector<128x32xf32>
    %12 = arith.maximumf %10, %11 : vector<128x32xf32>
    %c1 = arith.constant 1 : index
    %c0_8 = arith.constant 0 : index
    %c0_9 = arith.constant 0 : index
    %13 = vector.load %arg2[%c1, %c0_8, %c0_9] : memref<4x64x128xbf16, #tpu.memory_space<vmem>>, vector<1x64x128xbf16>
    %14 = vector.shape_cast %13 : vector<1x64x128xbf16> to vector<64x128xbf16>
    %15 = vector.extract_strided_slice %14 {offsets = [0, 0], sizes = [32, 32], strides = [1, 1]} : vector<64x128xbf16> to vector<32x32xbf16>
    %c1_10 = arith.constant 1 : index
    %c0_11 = arith.constant 0 : index
    %c0_12 = arith.constant 0 : index
    %16 = vector.load %arg3[%c1_10, %c0_11, %c0_12] : memref<4x1x128xf32, #tpu.memory_space<vmem>>, vector<1x1x128xf32>
    %17 = vector.shape_cast %16 : vector<1x1x128xf32> to vector<1x128xf32>
    %18 = vector.extract_strided_slice %17 {offsets = [0, 0], sizes = [1, 32], strides = [1, 1]} : vector<1x128xf32> to vector<1x32xf32>
    %19 = arith.truncf %12 : vector<128x32xf32> to vector<128x32xbf16>
    %cst_13 = arith.constant dense<0.000000e+00> : vector<128x32xf32>
    %20 = tpu.matmul %19, %15, %cst_13 {dimension_numbers = #tpu.dot_dimension_numbers<[1], [0], [0], [1], [0, 0, 1, 1], [], []>} : vector<128x32xbf16>, vector<32x32xbf16>, vector<128x32xf32> -> vector<128x32xf32>
    %21 = vector.broadcast %18 : vector<1x32xf32> to vector<128x32xf32>
    %22 = arith.addf %20, %21 : vector<128x32xf32>
    %cst_14 = arith.constant 0.000000e+00 : f32
    %23 = vector.broadcast %cst_14 : f32 to vector<128x32xf32>
    %24 = arith.maximumf %22, %23 : vector<128x32xf32>
    %c2 = arith.constant 2 : index
    %c0_15 = arith.constant 0 : index
    %c0_16 = arith.constant 0 : index
    %25 = vector.load %arg2[%c2, %c0_15, %c0_16] : memref<4x64x128xbf16, #tpu.memory_space<vmem>>, vector<1x64x128xbf16>
    %26 = vector.shape_cast %25 : vector<1x64x128xbf16> to vector<64x128xbf16>
    %27 = vector.extract_strided_slice %26 {offsets = [0, 0], sizes = [32, 64], strides = [1, 1]} : vector<64x128xbf16> to vector<32x64xbf16>
    %c2_17 = arith.constant 2 : index
    %c0_18 = arith.constant 0 : index
    %c0_19 = arith.constant 0 : index
    %28 = vector.load %arg3[%c2_17, %c0_18, %c0_19] : memref<4x1x128xf32, #tpu.memory_space<vmem>>, vector<1x1x128xf32>
    %29 = vector.shape_cast %28 : vector<1x1x128xf32> to vector<1x128xf32>
    %30 = vector.extract_strided_slice %29 {offsets = [0, 0], sizes = [1, 64], strides = [1, 1]} : vector<1x128xf32> to vector<1x64xf32>
    %31 = arith.truncf %24 : vector<128x32xf32> to vector<128x32xbf16>
    %cst_20 = arith.constant dense<0.000000e+00> : vector<128x64xf32>
    %32 = tpu.matmul %31, %27, %cst_20 {dimension_numbers = #tpu.dot_dimension_numbers<[1], [0], [0], [1], [0, 0, 1, 1], [], []>} : vector<128x32xbf16>, vector<32x64xbf16>, vector<128x64xf32> -> vector<128x64xf32>
    %33 = vector.broadcast %30 : vector<1x64xf32> to vector<128x64xf32>
    %34 = arith.addf %32, %33 : vector<128x64xf32>
    %cst_21 = arith.constant 0.000000e+00 : f32
    %35 = vector.broadcast %cst_21 : f32 to vector<128x64xf32>
    %36 = arith.maximumf %34, %35 : vector<128x64xf32>
    %c3 = arith.constant 3 : index
    %c0_22 = arith.constant 0 : index
    %c0_23 = arith.constant 0 : index
    %37 = vector.load %arg2[%c3, %c0_22, %c0_23] : memref<4x64x128xbf16, #tpu.memory_space<vmem>>, vector<1x64x128xbf16>
    %38 = vector.shape_cast %37 : vector<1x64x128xbf16> to vector<64x128xbf16>
    %39 = vector.extract_strided_slice %38 {offsets = [0, 0], sizes = [64, 5], strides = [1, 1]} : vector<64x128xbf16> to vector<64x5xbf16>
    %c3_24 = arith.constant 3 : index
    %c0_25 = arith.constant 0 : index
    %c0_26 = arith.constant 0 : index
    %40 = vector.load %arg3[%c3_24, %c0_25, %c0_26] : memref<4x1x128xf32, #tpu.memory_space<vmem>>, vector<1x1x128xf32>
    %41 = vector.shape_cast %40 : vector<1x1x128xf32> to vector<1x128xf32>
    %42 = vector.extract_strided_slice %41 {offsets = [0, 0], sizes = [1, 5], strides = [1, 1]} : vector<1x128xf32> to vector<1x5xf32>
    %43 = arith.truncf %36 : vector<128x64xf32> to vector<128x64xbf16>
    %cst_27 = arith.constant dense<0.000000e+00> : vector<128x5xf32>
    %44 = tpu.matmul %43, %39, %cst_27 {dimension_numbers = #tpu.dot_dimension_numbers<[1], [0], [0], [1], [0, 0, 1, 1], [], []>} : vector<128x64xbf16>, vector<64x5xbf16>, vector<128x5xf32> -> vector<128x5xf32>
    %45 = vector.broadcast %42 : vector<1x5xf32> to vector<128x5xf32>
    %46 = arith.addf %44, %45 : vector<128x5xf32>
    %cst_28 = arith.constant 0.000000e+00 : f32
    %47 = vector.broadcast %cst_28 : f32 to vector<128x5xf32>
    %48 = arith.maximumf %46, %47 : vector<128x5xf32>
    %49 = vector.extract_strided_slice %48 {offsets = [0, 0], sizes = [128, 4], strides = [1, 1]} : vector<128x5xf32> to vector<128x4xf32>
    %50 = vector.extract_strided_slice %48 {offsets = [0, 4], sizes = [128, 1], strides = [1, 1]} : vector<128x5xf32> to vector<128x1xf32>
    %cst_29 = arith.constant dense<0.000000e+00> : vector<128xf32>
    %51 = vector.multi_reduction <add>, %49, %cst_29 [1] : vector<128x4xf32> to vector<128xf32>
    %52 = vector.shape_cast %51 : vector<128xf32> to vector<128x1xf32>
    %cst_30 = arith.constant 2.500000e-01 : f32
    %53 = vector.broadcast %cst_30 : f32 to vector<128x1xf32>
    %54 = arith.mulf %52, %53 : vector<128x1xf32>
    %55 = vector.broadcast %50 : vector<128x1xf32> to vector<128x4xf32>
    %56 = arith.addf %55, %49 : vector<128x4xf32>
    %57 = vector.broadcast %54 : vector<128x1xf32> to vector<128x4xf32>
    %58 = arith.subf %56, %57 : vector<128x4xf32>
    %c0_31 = arith.constant 0 : index
    %c0_32 = arith.constant 0 : index
    %59 = vector.load %arg4[%c0_31, %c0_32] : memref<128x4xf32, #tpu.memory_space<vmem>>, vector<128x4xf32>
    tpu.vector_store %arg4[%c0_31, %c0_32], %58 {strides = array<i32>} : memref<128x4xf32, #tpu.memory_space<vmem>>, vector<128x4xf32>,
    return
  }
  func.func @transform_0(%arg0: i32) -> (i32, i32) {
    %c0_i32 = arith.constant 0 : i32
    %c0_i32_0 = arith.constant 0 : i32
    return %arg0, %c0_i32 : i32, i32
  }
  func.func @transform_1(%arg0: i32) -> (i32, i32, i32) {
    %c0_i32 = arith.constant 0 : i32
    %c0_i32_0 = arith.constant 0 : i32
    %c0_i32_1 = arith.constant 0 : i32
    %c0_i32_2 = arith.constant 0 : i32
    return %c0_i32, %c0_i32_0, %c0_i32_1 : i32, i32, i32
  }
  func.func @transform_2(%arg0: i32) -> (i32, i32, i32) {
    %c0_i32 = arith.constant 0 : i32
    %c0_i32_0 = arith.constant 0 : i32
    %c0_i32_1 = arith.constant 0 : i32
    %c0_i32_2 = arith.constant 0 : i32
    return %c0_i32, %c0_i32_0, %c0_i32_1 : i32, i32, i32
  }
  func.func @transform_3(%arg0: i32) -> (i32, i32) {
    %c0_i32 = arith.constant 0 : i32
    %c0_i32_0 = arith.constant 0 : i32
    return %arg0, %c0_i32 : i32, i32
  }
}

</mosaic_0001>

<bundles_post_ra>
// kernel: tpu_custom_call.1
= control target key start
LH: loop header
LB: loop body
LE: loop exit
PB: predicated region body
PF: predicated region fallthrough
CT: control target
= control target key end

     0   :  { %s1376_s12 = smov 0   ;;  %s1607_s0 = inlined_call_operand.vmem [shape: f32[256,16], index: 0, kind: input, shape index: {}]   ;;  %s1608_s1 = inlined_call_operand.vmem [shape: bf16[4,64,128], index: 1, kind: input, shape index: {}]   ;;  %s1609_s2 = inlined_call_operand.vmem [shape: f32[4,1,128], index: 2, kind: input, shape index: {}]   ;;  %s1610_s3 = inlined_call_operand.vmem [shape: f32[256,4], index: 3, kind: output, shape index: {}]  }
   0x1 LB: > { %s1129_s13 = sadd.s32 4294967295, %s1353_s12   ;;  %p1133_p0 = scmp.ge.s32.totalorder %s1353_s12, 1  ;;  %s1353_s12 = sphi %s1376_s12, %s13_s12  }
   0x2   : > { %p138_p1 = scmp.lt.s32.totalorder %s1353_s12, 3 }
   0x4   : > { %p139_p2 = pnand %p1133_p0, %p138_p1 }
   0x5   : > { %v1338_v0 = vld [vmem:[%s1608_s1] sm:$0xff] (!%p139_p2)   ;;  %s1134_s16 = sshll.u32 (!%p139_p2), %s1129_s13, 4  ;;  %vm214_vm0 = vcmask (!%p139_p2), 130048   ;;  %v1340_v26 = vld [vmem:[%s1608_s1 + $0x28] sm:$0xff] (!%p139_p2)   ;;  %vm385_vm1 = vcmask (!%p139_p2), 261120   ;;  %vm742_vm2 = vcmask (!%p139_p2), 523264  }
   0x6   : > { %142 = sbr.rel (%p139_p2) target bundleno = 1378 (0x562), region = 32  ;;  %p163_p3 = scmp.lt.s32.totalorder (!%p139_p2), %s1134_s16, 31  ;;  %1245 = vmatprep.subr.bf16.mxu0 (!%p139_p2), %v1338_v0  ;;  %v1339_v25 = vld [vmem:[%s1608_s1 + $0x20] sm:$0xff] (!%p139_p2)   ;;  %v1342_v28 = vld [vmem:[%s1608_s1 + $0x48] sm:$0xff] (!%p139_p2)   ;;  %vm880_vm3 = vcmask (!%p139_p2), 31744  }
   0x7   : > { %1246 = vmatpush3.bf16.msra.mxu0 (!%p139_p2), %v1338_v0  ;;  %1263 = vmatprep.subr.bf16.mxu1 (!%p139_p2), %v1339_v25  ;;  %v1341_v27 = vld [vmem:[%s1608_s1 + $0x40] sm:$0xff] (!%p139_p2)  }
   0x8   : > { %1264 = vmatpush3.bf16.msra.mxu1 (!%p139_p2), %v1339_v25  ;;  %1283 = vmatprep.subr.bf16.mxu0 (!%p139_p2), %v1341_v27  ;;  %v1138_v29 = vld [vmem:[%s1609_s2] ss:$0 sm:$0xff] (!%p139_p2)  ;;  %v1153_v25 = vld [vmem:[%s1609_s2 + $0x1] ss:$0 sm:$0xff] (!%p139_p2) }
   0x9   : > { %1265 = vmatprep.subr.bf16.mxu1 (!%p139_p2), %v1340_v26 }
   0xc   : > { %1266 = vmatpush3.bf16.msra.mxu1 (!%p139_p2), %v1340_v26 }
   0xd   : > { %s1612_s16 = smov (!%p163_p3, %s1134_s16), 31 }
   0xe   : > { %s1135_s17 = sshll.u32 %s1612_s16, 3 }
   0xf   : > { %s1395_s20 = scalar_lea.vmem %s1607_s0, %s1135_s17  ;;  %s1545_s23 = scalar_lea.vmem %s1610_s3, %s1135_s17 }
  0x10   : > { %v175_v1 = vld [vmem:[%s1395_s20] sm:$0xff]  ;;  %v176_v2 = vld [vmem:[%s1395_s20 + $0x8] sm:$0xff]  ;;  %v177_v3 = vld [vmem:[%s1395_s20 + $0x10] sm:$0xff] }
  0x11   : > { %v194_v4 = vpack.c.bf16 %v176_v2, %v175_v1  ;;  %v178_v5 = vld [vmem:[%s1395_s20 + $0x18] sm:$0xff]  ;;  %v179_v6 = vld [vmem:[%s1395_s20 + $0x20] sm:$0xff]  ;;  %v180_v7 = vld [vmem:[%s1395_s20 + $0x28] sm:$0xff] }
  0x12   : > { %v195_v8 = vpack.c.bf16 %v178_v5, %v177_v3  ;;  %v196_v9 = vpack.c.bf16 %v180_v7, %v179_v6  ;;  %v181_v10 = vld [vmem:[%s1395_s20 + $0x30] sm:$0xff]  ;;  %v182_v11 = vld [vmem:[%s1395_s20 + $0x38] sm:$0xff]  ;;  %v183_v12 = vld [vmem:[%s1395_s20 + $0x40] sm:$0xff] }
  0x13   : > { %1247 = vmatprep.mubr.msk.bf16.mxu0 %vm214_vm0, %v194_v4  ;;  %v184_v13 = vld [vmem:[%s1395_s20 + $0x48] sm:$0xff]  ;;  %v197_v14 = vpack.c.bf16 %v182_v11, %v181_v10  ;;  %v185_v16 = vld [vmem:[%s1395_s20 + $0x50] sm:$0xff]  ;;  %v186_v17 = vld [vmem:[%s1395_s20 + $0x58] sm:$0xff] }
  0x14   : > { %1248 = vmatmul.mubr.msk.bf16.vlgmr.msra.gmra.mrb[0].mxu0 %vm214_vm0, %v195_v8  ;;  %v198_v15 = vpack.c.bf16 %v184_v13, %v183_v12  ;;  %v187_v18 = vld [vmem:[%s1395_s20 + $0x60] sm:$0xff]  ;;  %v188_v19 = vld [vmem:[%s1395_s20 + $0x68] sm:$0xff]  ;;  %v199_v20 = vpack.c.bf16 %v186_v17, %v185_v16  ;;  %v189_v22 = vld [vmem:[%s1395_s20 + $0x70] sm:$0xff] }
  0x15   : > { %1251 = vmatprep.mubr.msk.bf16.mxu0 %vm214_vm0, %v196_v9  ;;  %v200_v21 = vpack.c.bf16 %v188_v19, %v187_v18  ;;  %v190_v23 = vld [vmem:[%s1395_s20 + $0x78] sm:$0xff]  ;;  %1284 = vmatpush3.bf16.msra.mxu0 %v1341_v27 }
  0x16   : > { %v201_v24 = vpack.c.bf16 %v190_v23, %v189_v22  ;;  %1285 = vmatprep.subr.bf16.mxu0 %v1342_v28  ;;  %v1343_v22 = vld [vmem:[%s1608_s1 + $0x60] sm:$0xff]   ;;  %v1344_v23 = vld [vmem:[%s1608_s1 + $0x68] sm:$0xff]  }
  0x17   : > { %1303 = vmatprep.subr.bf16.mxu1 %v1343_v22 }
  0x19   : > { %1286 = vmatpush3.bf16.msra.mxu0 %v1342_v28 }
  0x1c   : > { %1252 = vmatmul.mubr.msk.bf16.gmra.mrb[4].mxu0 %vm214_vm0, %v197_v14 }
  0x1d   : > { %1255 = vmatprep.mubr.msk.bf16.mxu0 %vm214_vm0, %v198_v15 }
  0x24   : > { %1256 = vmatmul.mubr.msk.bf16.gmra.mrb[8].mxu0 %vm214_vm0, %v199_v20 }
  0x25   : > { %1259 = vmatprep.mubr.msk.bf16.mxu0 %vm214_vm0, %v200_v21 }
  0x2c   : > { %1260 = vmatmul.mubr.msk.bf16.gmra.mrb[12].mxu0 %vm214_vm0, %v201_v24  ;;  %v1345_v24 = vld [vmem:[%s1608_s1 + $0x70] sm:$0xff]  }
  0xe7   : > { %v1249_v30 = vpop.f32.mrb[0].mxu0 }
  0xe8   : > { %v282_v31 = vadd.f32 %v1249_v30, %v1138_v29  ;;  %v273_v32 = vpop.f32.mrb[1].mxu0 }
  0xe9   : > { %v274_v33 = vadd.f32 %v1138_v29, %v273_v32  ;;  %v1250_v34 = vpop.f32.mrb[2].mxu0 }
  0xea   : > { %v285_v35 = vadd.f32 %v1250_v34, %v1138_v29  ;;  %v276_v36 = vpop.f32.mrb[3].mxu0  ;;  %v338_v38 = vmax.f32 %v282_v31, 0.0 }
  0xeb   : > { %v277_v37 = vadd.f32 %v1138_v29, %v276_v36  ;;  %v336_v40 = vmax.f32 %v274_v33, 0.0 }
  0xec   : > { %v339_v39 = vmax.f32 %v285_v35, 0.0 }
  0xed   : > { %v337_v41 = vmax.f32 %v277_v37, 0.0 }
  0xee   : > { %v360_v42 = vpack.c.bf16 %v339_v39, %v338_v38 }
  0xef   : > { %v359_v43 = vpack.c.bf16 %v337_v41, %v336_v40  ;;  %v1253_v44 = vpop.f32.mrb[4].mxu0 }
  0xf0   : > { %v298_v45 = vadd.f32 %v1253_v44, %v1138_v29  ;;  %v289_v46 = vpop.f32.mrb[5].mxu0 }
  0xf1   : > { %1267 = vmatprep.mubr.msk.bf16.mxu1 %vm385_vm1, %v359_v43  ;;  %v290_v47 = vadd.f32 %v1138_v29, %v289_v46  ;;  %v1254_v48 = vpop.f32.mrb[6].mxu0 }
  0xf2   : > { %1268 = vmatmul.mubr.msk.bf16.vlgmr.msra.gmra.mrb[0].mxu1 %vm385_vm1, %v360_v42  ;;  %v342_v49 = vmax.f32 %v298_v45, 0.0  ;;  %v301_v50 = vadd.f32 %v1254_v48, %v1138_v29  ;;  %v292_v51 = vpop.f32.mrb[7].mxu0 }
  0xf3   : > { %v340_v52 = vmax.f32 %v290_v47, 0.0  ;;  %v293_v53 = vadd.f32 %v1138_v29, %v292_v51  ;;  %1304 = vmatpush3.bf16.msra.mxu1 %v1343_v22 }
  0xf4   : > { %v343_v54 = vmax.f32 %v301_v50, 0.0  ;;  %1305 = vmatprep.subr.bf16.mxu1 %v1344_v23 }
  0xf5   : > { %v341_v55 = vmax.f32 %v293_v53, 0.0 }
  0xf6   : > { %v362_v56 = vpack.c.bf16 %v343_v54, %v342_v49 }
  0xf7   : > { %v361_v57 = vpack.c.bf16 %v341_v55, %v340_v52  ;;  %v1257_v58 = vpop.f32.mrb[8].mxu0  ;;  %1306 = vmatpush3.bf16.msra.mxu1 %v1344_v23 }
  0xf8   : > { %v314_v59 = vadd.f32 %v1257_v58, %v1138_v29  ;;  %v305_v60 = vpop.f32.mrb[9].mxu0  ;;  %1307 = vmatprep.subr.bf16.mxu1 %v1345_v24 }
  0xf9   : > { %v306_v61 = vadd.f32 %v1138_v29, %v305_v60  ;;  %v1258_v62 = vpop.f32.mrb[10].mxu0  ;;  %1271 = vmatprep.mubr.msk.bf16.mxu1 %vm385_vm1, %v361_v57 }
  0xfa   : > { %v346_v63 = vmax.f32 %v314_v59, 0.0  ;;  %v317_v0 = vadd.f32 %v1258_v62, %v1138_v29  ;;  %v308_v1 = vpop.f32.mrb[11].mxu0  ;;  %1272 = vmatmul.mubr.msk.bf16.gmra.mrb[4].mxu1 %vm385_vm1, %v362_v56 }
  0xfb   : > { %v344_v2 = vmax.f32 %v306_v61, 0.0  ;;  %v309_v3 = vadd.f32 %v1138_v29, %v308_v1  ;;  %1308 = vmatpush3.bf16.msra.mxu1 %v1345_v24 }
  0xfc   : > { %v347_v4 = vmax.f32 %v317_v0, 0.0 }
  0xfd   : > { %v345_v5 = vmax.f32 %v309_v3, 0.0 }
  0xfe   : > { %v364_v6 = vpack.c.bf16 %v347_v4, %v346_v63 }
  0xff   : > { %v363_v7 = vpack.c.bf16 %v345_v5, %v344_v2  ;;  %v1261_v8 = vpop.f32.mrb[12].mxu0 }
 0x100   : > { %v330_v9 = vadd.f32 %v1261_v8, %v1138_v29  ;;  %v321_v10 = vpop.f32.mrb[13].mxu0 }
 0x101   : > { %1275 = vmatprep.mubr.msk.bf16.mxu1 %vm385_vm1, %v363_v7  ;;  %v322_v11 = vadd.f32 %v1138_v29, %v321_v10  ;;  %v1262_v12 = vpop.f32.mrb[14].mxu0 }
 0x102   : > { %1276 = vmatmul.mubr.msk.bf16.gmra.mrb[8].mxu1 %vm385_vm1, %v364_v6  ;;  %v350_v13 = vmax.f32 %v330_v9, 0.0  ;;  %v333_v14 = vadd.f32 %v1262_v12, %v1138_v29  ;;  %v324_v15 = vpop.f32.mrb[15].mxu0 }
 0x103   : > { %v348_v16 = vmax.f32 %v322_v11, 0.0  ;;  %v325_v17 = vadd.f32 %v1138_v29, %v324_v15 }
 0x104   : > { %v351_v18 = vmax.f32 %v333_v14, 0.0 }
 0x105   : > { %v349_v19 = vmax.f32 %v325_v17, 0.0 }
 0x106   : > { %v366_v20 = vpack.c.bf16 %v351_v18, %v350_v13  ;;  %v1346_v18 = vld [vmem:[%s1608_s1 + $0x78] sm:$0xff]  }
 0x107   : > { %v365_v21 = vpack.c.bf16 %v349_v19, %v348_v16  ;;  %1309 = vmatprep.subr.bf16.mxu1 %v1346_v18  ;;  %v1169_v19 = vld [vmem:[%s1609_s2 + $0x2] ss:$0 sm:$0xff] }
 0x108   : > { %1310 = vmatpush3.bf16.msra.mxu1 %v1346_v18 }
 0x109   : > { %1279 = vmatprep.mubr.msk.bf16.mxu1 %vm385_vm1, %v365_v21 }
 0x10a   : > { %1280 = vmatmul.mubr.msk.bf16.gmra.mrb[12].mxu1 %vm385_vm1, %v366_v20 }
 0x1c5   : > { %v1269_v26 = vpop.f32.mrb[0].mxu1 }
 0x1c6   : > { %v453_v27 = vadd.f32 %v1269_v26, %v1153_v25  ;;  %v444_v28 = vpop.f32.mrb[1].mxu1 }
 0x1c7   : > { %v445_v29 = vadd.f32 %v1153_v25, %v444_v28  ;;  %v1270_v30 = vpop.f32.mrb[2].mxu1 }
 0x1c8   : > { %v456_v31 = vadd.f32 %v1270_v30, %v1153_v25  ;;  %v447_v32 = vpop.f32.mrb[3].mxu1  ;;  %v509_v34 = vmax.f32 %v453_v27, 0.0 }
 0x1c9   : > { %v448_v33 = vadd.f32 %v1153_v25, %v447_v32  ;;  %v507_v36 = vmax.f32 %v445_v29, 0.0 }
 0x1ca   : > { %v510_v35 = vmax.f32 %v456_v31, 0.0 }
 0x1cb   : > { %v508_v37 = vmax.f32 %v448_v33, 0.0 }
 0x1cc   : > { %v531_v38 = vpack.c.bf16 %v510_v35, %v509_v34 }
 0x1cd   : > { %v530_v39 = vpack.c.bf16 %v508_v37, %v507_v36  ;;  %v1273_v40 = vpop.f32.mrb[4].mxu1 }
 0x1ce   : > { %v469_v41 = vadd.f32 %v1273_v40, %v1153_v25  ;;  %v460_v42 = vpop.f32.mrb[5].mxu1 }
 0x1cf   : > { %1287 = vmatprep.mubr.msk.bf16.mxu0 %vm385_vm1, %v530_v39  ;;  %v461_v43 = vadd.f32 %v1153_v25, %v460_v42  ;;  %v1274_v44 = vpop.f32.mrb[6].mxu1 }
 0x1d0   : > { %1288 = vmatmul.mubr.msk.bf16.vlgmr.msra.gmra.mrb[16].mxu0 %vm385_vm1, %v531_v38  ;;  %v513_v45 = vmax.f32 %v469_v41, 0.0  ;;  %v472_v46 = vadd.f32 %v1274_v44, %v1153_v25  ;;  %v463_v47 = vpop.f32.mrb[7].mxu1 }
 0x1d1   : > { %v511_v48 = vmax.f32 %v461_v43, 0.0  ;;  %v464_v49 = vadd.f32 %v1153_v25, %v463_v47 }
 0x1d2   : > { %v514_v50 = vmax.f32 %v472_v46, 0.0 }
 0x1d3   : > { %v512_v51 = vmax.f32 %v464_v49, 0.0 }
 0x1d4   : > { %v533_v52 = vpack.c.bf16 %v514_v50, %v513_v45 }
 0x1d5   : > { %v532_v53 = vpack.c.bf16 %v512_v51, %v511_v48  ;;  %v1277_v54 = vpop.f32.mrb[8].mxu1 }
 0x1d6   : > { %v485_v55 = vadd.f32 %v1277_v54, %v1153_v25  ;;  %v476_v56 = vpop.f32.mrb[9].mxu1 }
 0x1d7   : > { %v477_v57 = vadd.f32 %v1153_v25, %v476_v56  ;;  %v1278_v58 = vpop.f32.mrb[10].mxu1  ;;  %1291 = vmatprep.mubr.msk.bf16.mxu0 %vm385_vm1, %v532_v53 }
 0x1d8   : > { %v517_v59 = vmax.f32 %v485_v55, 0.0  ;;  %v488_v60 = vadd.f32 %v1278_v58, %v1153_v25  ;;  %v479_v61 = vpop.f32.mrb[11].mxu1  ;;  %1292 = vmatmul.mubr.msk.bf16.gmra.mrb[20].mxu0 %vm385_vm1, %v533_v52 }
 0x1d9   : > { %v515_v62 = vmax.f32 %v477_v57, 0.0  ;;  %v480_v63 = vadd.f32 %v1153_v25, %v479_v61 }
 0x1da   : > { %v518_v0 = vmax.f32 %v488_v60, 0.0 }
 0x1db   : > { %v516_v1 = vmax.f32 %v480_v63, 0.0 }
 0x1dc   : > { %v535_v2 = vpack.c.bf16 %v518_v0, %v517_v59 }
 0x1dd   : > { %v534_v3 = vpack.c.bf16 %v516_v1, %v515_v62  ;;  %v1281_v4 = vpop.f32.mrb[12].mxu1 }
 0x1de   : > { %v501_v5 = vadd.f32 %v1281_v4, %v1153_v25  ;;  %v492_v6 = vpop.f32.mrb[13].mxu1 }
 0x1df   : > { %1295 = vmatprep.mubr.msk.bf16.mxu0 %vm385_vm1, %v534_v3  ;;  %v493_v7 = vadd.f32 %v1153_v25, %v492_v6  ;;  %v1282_v8 = vpop.f32.mrb[14].mxu1 }
 0x1e0   : > { %1296 = vmatmul.mubr.msk.bf16.gmra.mrb[24].mxu0 %vm385_vm1, %v535_v2  ;;  %v521_v9 = vmax.f32 %v501_v5, 0.0  ;;  %v504_v10 = vadd.f32 %v1282_v8, %v1153_v25  ;;  %v495_v11 = vpop.f32.mrb[15].mxu1 }
 0x1e1   : > { %v519_v12 = vmax.f32 %v493_v7, 0.0  ;;  %v496_v13 = vadd.f32 %v1153_v25, %v495_v11 }
 0x1e2   : > { %v522_v14 = vmax.f32 %v504_v10, 0.0 }
 0x1e3   : > { %v520_v15 = vmax.f32 %v496_v13, 0.0  ;;  %v1189_v13 = vld [vmem:[%s1609_s2 + $0x3] ss:$0 sm:$0xff] }
 0x1e4   : > { %v537_v16 = vpack.c.bf16 %v522_v14, %v521_v9 }
 0x1e5   : > { %v536_v17 = vpack.c.bf16 %v520_v15, %v519_v12  ;;  %v1355_v12 = vmov 4  }
 0x1e6   : > { %1336 = vset.pattern.permute.xlu1 %v1355_v12  ;;  %1337 = vset.pattern.permute.xlu0 %v1355_v12 }
 0x1e7   : > { %1299 = vmatprep.mubr.msk.bf16.mxu0 %vm385_vm1, %v536_v17 }
 0x1e8   : > { %1300 = vmatmul.mubr.msk.bf16.gmra.mrb[28].mxu0 %vm385_vm1, %v537_v16 }
 0x2a3   : > { %v1289_v20 = vpop.f32.mrb[16].mxu0 }
 0x2a4   : > { %v623_v21 = vadd.f32 %v1289_v20, %v1169_v19  ;;  %v614_v22 = vpop.f32.mrb[17].mxu0 }
 0x2a5   : > { %v615_v23 = vadd.f32 %v1169_v19, %v614_v22  ;;  %v1290_v24 = vpop.f32.mrb[18].mxu0 }
 0x2a6   : > { %v626_v25 = vadd.f32 %v1290_v24, %v1169_v19  ;;  %v617_v26 = vpop.f32.mrb[19].mxu0  ;;  %v679_v28 = vmax.f32 %v623_v21, 0.0 }
 0x2a7   : > { %v618_v27 = vadd.f32 %v1169_v19, %v617_v26  ;;  %v677_v30 = vmax.f32 %v615_v23, 0.0 }
 0x2a8   : > { %v680_v29 = vmax.f32 %v626_v25, 0.0 }
 0x2a9   : > { %v678_v31 = vmax.f32 %v618_v27, 0.0 }
 0x2aa   : > { %v705_v32 = vpack.c.bf16 %v680_v29, %v679_v28 }
 0x2ab   : > { %v704_v33 = vpack.c.bf16 %v678_v31, %v677_v30  ;;  %v1293_v34 = vpop.f32.mrb[20].mxu0 }
 0x2ac   : > { %v639_v35 = vadd.f32 %v1293_v34, %v1169_v19  ;;  %v630_v36 = vpop.f32.mrb[21].mxu0 }
 0x2ad   : > { %1311 = vmatprep.mubr.msk.bf16.mxu1 %vm742_vm2, %v704_v33  ;;  %v631_v37 = vadd.f32 %v1169_v19, %v630_v36  ;;  %v1294_v38 = vpop.f32.mrb[22].mxu0 }
 0x2ae   : > { %1312 = vmatmul.mubr.msk.bf16.vlgmr.msra.gmra.mrb[16].mxu1 %vm742_vm2, %v705_v32  ;;  %v683_v39 = vmax.f32 %v639_v35, 0.0  ;;  %v642_v40 = vadd.f32 %v1294_v38, %v1169_v19  ;;  %v633_v41 = vpop.f32.mrb[23].mxu0 }
 0x2af   : > { %v681_v42 = vmax.f32 %v631_v37, 0.0  ;;  %v634_v43 = vadd.f32 %v1169_v19, %v633_v41 }
 0x2b0   : > { %v684_v44 = vmax.f32 %v642_v40, 0.0 }
 0x2b1   : > { %v682_v45 = vmax.f32 %v634_v43, 0.0 }
 0x2b2   : > { %v707_v46 = vpack.c.bf16 %v684_v44, %v683_v39 }
 0x2b3   : > { %v706_v47 = vpack.c.bf16 %v682_v45, %v681_v42  ;;  %v1297_v48 = vpop.f32.mrb[24].mxu0 }
 0x2b4   : > { %v655_v49 = vadd.f32 %v1297_v48, %v1169_v19  ;;  %v646_v50 = vpop.f32.mrb[25].mxu0 }
 0x2b5   : > { %v647_v51 = vadd.f32 %v1169_v19, %v646_v50  ;;  %v1298_v52 = vpop.f32.mrb[26].mxu0  ;;  %1315 = vmatprep.mubr.msk.bf16.mxu1 %vm742_vm2, %v706_v47 }
 0x2b6   : > { %v687_v53 = vmax.f32 %v655_v49, 0.0  ;;  %v658_v54 = vadd.f32 %v1298_v52, %v1169_v19  ;;  %v649_v55 = vpop.f32.mrb[27].mxu0  ;;  %1316 = vmatmul.mubr.msk.bf16.gmra.mrb[20].mxu1 %vm742_vm2, %v707_v46 }
 0x2b7   : > { %v685_v56 = vmax.f32 %v647_v51, 0.0  ;;  %v650_v57 = vadd.f32 %v1169_v19, %v649_v55 }
 0x2b8   : > { %v688_v58 = vmax.f32 %v658_v54, 0.0 }
 0x2b9   : > { %v686_v59 = vmax.f32 %v650_v57, 0.0 }
 0x2ba   : > { %v709_v60 = vpack.c.bf16 %v688_v58, %v687_v53 }
 0x2bb   : > { %v708_v61 = vpack.c.bf16 %v686_v59, %v685_v56  ;;  %v1301_v62 = vpop.f32.mrb[28].mxu0 }
 0x2bc   : > { %v671_v63 = vadd.f32 %v1301_v62, %v1169_v19  ;;  %v662_v0 = vpop.f32.mrb[29].mxu0 }
 0x2bd   : > { %1319 = vmatprep.mubr.msk.bf16.mxu1 %vm742_vm2, %v708_v61  ;;  %v663_v1 = vadd.f32 %v1169_v19, %v662_v0  ;;  %v1302_v2 = vpop.f32.mrb[30].mxu0 }
 0x2be   : > { %1320 = vmatmul.mubr.msk.bf16.gmra.mrb[24].mxu1 %vm742_vm2, %v709_v60  ;;  %v691_v3 = vmax.f32 %v671_v63, 0.0  ;;  %v674_v4 = vadd.f32 %v1302_v2, %v1169_v19  ;;  %v665_v5 = vpop.f32.mrb[31].mxu0 }
 0x2bf   : > { %v689_v6 = vmax.f32 %v663_v1, 0.0  ;;  %v666_v7 = vadd.f32 %v1169_v19, %v665_v5 }
 0x2c0   : > { %v692_v8 = vmax.f32 %v674_v4, 0.0 }
 0x2c1   : > { %v690_v9 = vmax.f32 %v666_v7, 0.0 }
 0x2c2   : > { %v711_v10 = vpack.c.bf16 %v692_v8, %v691_v3 }
 0x2c3   : > { %v710_v11 = vpack.c.bf16 %v690_v9, %v689_v6 }
 0x2c5   : > { %1323 = vmatprep.mubr.msk.bf16.mxu1 %vm742_vm2, %v710_v11 }
 0x2c6   : > { %1324 = vmatmul.mubr.msk.bf16.gmra.mrb[28].mxu1 %vm742_vm2, %v711_v10 }
 0x381   : > { %v1313_v14 = vpop.f32.mrb[16].mxu1 }
 0x382   : > { %v810_v15 = vadd.f32 %v1313_v14, %v1189_v13  ;;  %v801_v16 = vpop.f32.mrb[17].mxu1 }
 0x383   : > { %v802_v17 = vadd.f32 %v1189_v13, %v801_v16  ;;  %v1314_v18 = vpop.f32.mrb[18].mxu1 }
 0x384   : > { %v1481_v19 = vmax.f32 %v810_v15, 0.0  ;;  %v804_v20 = vpop.f32.mrb[19].mxu1  ;;  %v813_v58 = vadd.f32 %v1314_v18, %v1189_v13 }
 0x385   : > { %v1483_v21 = vmax.f32 %v802_v17, 0.0  ;;  %v805_v42 = vadd.f32 %v1189_v13, %v804_v20 }
 0x386   : > { %957 = vperm.xlu1 %1336, %v1481_v19   ;;  %v887_v48 = vsel %vm880_vm3, %v1481_v19, 0.0  ;;  %v867_v60 = vmax.f32 %v813_v58, 0.0 }
 0x387   : > { %947 = vperm.xlu0 %1337, %v1483_v21   ;;  %v1489_v44 = vmax.f32 %v805_v42, 0.0  ;;  %v881_v45 = vsel %vm880_vm3, %v1483_v21, 0.0 }
 0x388   : > { %v890_v63 = vsel %vm880_vm3, %v867_v60, 0.0 }
 0x389   : > { %v1317_v22 = vpop.f32.mrb[20].mxu1  ;;  %v884_v49 = vsel %vm880_vm3, %v1489_v44, 0.0 }
 0x38a   : > { %v817_v23 = vpop.f32.mrb[21].mxu1  ;;  %v826_v43 = vadd.f32 %v1317_v22, %v1189_v13 }
 0x38b   : > { %v1318_v24 = vpop.f32.mrb[22].mxu1  ;;  %v818_v47 = vadd.f32 %v1189_v13, %v817_v23 }
 0x38c   : > { %v829_v25 = vadd.f32 %v1318_v24, %v1189_v13  ;;  %v820_v26 = vpop.f32.mrb[23].mxu1  ;;  %v1493_v46 = vmax.f32 %v826_v43, 0.0 }
 0x38d   : > { %v1487_v27 = vadd.f32 %v1189_v13, %v820_v26  ;;  %v1499_v50 = vmax.f32 %v818_v47, 0.0 }
 0x38e   : > { %v899_v51 = vsel %vm880_vm3, %v1493_v46, 0.0  ;;  %v871_v4 = vmax.f32 %v829_v25, 0.0 }
 0x38f   : > { %v893_v54 = vsel %vm880_vm3, %v1499_v50, 0.0  ;;  %v869_v8 = vmax.f32 %v1487_v27, 0.0 }
 0x390   : > { %v902_v7 = vsel %vm880_vm3, %v871_v4, 0.0 }
 0x391   : > { %v1321_v28 = vpop.f32.mrb[24].mxu1  ;;  %v896_v20 = vsel %vm880_vm3, %v869_v8, 0.0 }
 0x392   : > { %v833_v29 = vpop.f32.mrb[25].mxu1  ;;  %v842_v52 = vadd.f32 %v1321_v28, %v1189_v13 }
 0x393   : > { %v1322_v30 = vpop.f32.mrb[26].mxu1  ;;  %v834_v55 = vadd.f32 %v1189_v13, %v833_v29 }
 0x394   : > { %v845_v31 = vadd.f32 %v1322_v30, %v1189_v13  ;;  %v836_v32 = vpop.f32.mrb[27].mxu1  ;;  %v1503_v53 = vmax.f32 %v842_v52, 0.0 }
 0x395   : > { %v837_v33 = vadd.f32 %v1189_v13, %v836_v32  ;;  %v1507_v56 = vmax.f32 %v834_v55, 0.0 }
 0x396   : > { %v911_v57 = vsel %vm880_vm3, %v1503_v53, 0.0  ;;  %v1513_v61 = vmax.f32 %v845_v31, 0.0 }
 0x397   : > { %v905_v59 = vsel %vm880_vm3, %v1507_v56, 0.0  ;;  %v1515_v62 = vmax.f32 %v837_v33, 0.0 }
 0x399   : > { %v1325_v34 = vpop.f32.mrb[28].mxu1 }
 0x39a   : > { %v858_v35 = vadd.f32 %v1325_v34, %v1189_v13  ;;  %v849_v36 = vpop.f32.mrb[29].mxu1 }
 0x39b   : > { %v850_v37 = vadd.f32 %v1189_v13, %v849_v36  ;;  %v1326_v38 = vpop.f32.mrb[30].mxu1 }
 0x39c   : > { %v861_v39 = vadd.f32 %v1326_v38, %v1189_v13  ;;  %v852_v40 = vpop.f32.mrb[31].mxu1  ;;  %v1520_v0 = vmax.f32 %v858_v35, 0.0 }
 0x39d   : > { %v853_v41 = vadd.f32 %v1189_v13, %v852_v40  ;;  %v1523_v1 = vmax.f32 %v850_v37, 0.0  ;;  %v914_v40 = vsel %vm880_vm3, %v1513_v61, 0.0 }
 0x39e   : > { %v923_v2 = vsel %vm880_vm3, %v1520_v0, 0.0  ;;  %v1533_v6 = vmax.f32 %v861_v39, 0.0 }
 0x39f   : > { %v917_v3 = vsel %vm880_vm3, %v1523_v1, 0.0  ;;  %v1531_v5 = vmax.f32 %v853_v41, 0.0  ;;  %v908_v41 = vsel %vm880_vm3, %v1515_v62, 0.0 }
 0x3a0   : > { %v926_v47 = vsel %vm880_vm3, %v1533_v6, 0.0 }
 0x3a6   : > { %882 = vadd.xlane.f32.xlu0 %v881_v45 }
 0x3aa   : > { %888 = vadd.xlane.f32.xlu1 %v887_v48  ;;  %885 = vadd.xlane.f32.xlu0 %v884_v49  ;;  %v920_v48 = vsel %vm880_vm3, %v1531_v5, 0.0 }
 0x3ae   : > { %900 = vadd.xlane.f32.xlu0 %v899_v51 }
 0x3b2   : > { %894 = vadd.xlane.f32.xlu0 %v893_v54 }
 0x3b6   : > { %912 = vadd.xlane.f32.xlu0 %v911_v57 }
 0x3ba   : > { %906 = vadd.xlane.f32.xlu0 %v905_v59 }
 0x3bb   : > { %962 = vperm.xlu1 %1336, %v867_v60  }
 0x3d0   : > { %1002 = vperm.xlu0 %1337, %v1513_v61  }
 0x3d4   : > { %992 = vperm.xlu0 %1337, %v1515_v62  }
 0x3df   : > { %891 = vadd.xlane.f32.xlu1 %v890_v63 }
 0x3f0   : > { %952 = vperm.xlu1 %1336, %v1489_v44  }
 0x3f3   : > { %924 = vadd.xlane.f32.xlu0 %v923_v2 }
 0x3f4   : > { %977 = vperm.xlu1 %1336, %v1493_v46  }
 0x3f7   : > { %918 = vadd.xlane.f32.xlu0 %v917_v3 }
 0x3f8   : > { %967 = vperm.xlu1 %1336, %v1499_v50  }
 0x3fc   : > { %982 = vperm.xlu1 %1336, %v871_v4  }
 0x405   : > { %v958_v10 = vpop.permute.xlu1 %957 }
 0x406   : > { %v948_v9 = vpop.permute.xlu0 %947  ;;  %v1027_v16 = vadd.f32 %v958_v10, %v1481_v19 }
 0x407   : > { %v1025_v12 = vadd.f32 %v948_v9, %v1483_v21 }
 0x40d   : > { %1012 = vperm.xlu0 %1337, %v1531_v5  }
 0x411   : > { %1022 = vperm.xlu0 %1337, %v1533_v6  }
 0x420   : > { %903 = vadd.xlane.f32.xlu1 %v902_v7 }
 0x431   : > { %972 = vperm.xlu1 %1336, %v869_v8  }
 0x433   : > { %v883_v11 = vpop.xlane.xlu0 %882 }
 0x434   : > { %v929_v13 = vmul.f32 0.25, %v883_v11 }
 0x436   : > { %v1041_v14 = vsub.f32 %v1025_v12, %v929_v13 }
 0x437   : > { %v889_v15 = vpop.xlane.xlu1 %888  ;;  %v886_v19 = vpop.xlane.xlu0 %885 }
 0x438   : > { %1057 = vst.msk [vmem:[%s1545_s23] sm:$0xff] %vm880_vm3, %v1041_v14  ;;  %v931_v17 = vmul.f32 0.25, %v889_v15  ;;  %v930_v27 = vmul.f32 0.25, %v886_v19 }
 0x43a   : > { %v1043_v18 = vsub.f32 %v1027_v16, %v931_v17 }
 0x43b   : > { %v963_v21 = vpop.permute.xlu1 %962  ;;  %v901_v29 = vpop.xlane.xlu0 %900 }
 0x43c   : > { %1059 = vst.msk [vmem:[%s1545_s23 + $0x10] sm:$0xff] %vm880_vm3, %v1043_v18  ;;  %v1028_v23 = vadd.f32 %v963_v21, %v867_v60  ;;  %v935_v30 = vmul.f32 0.25, %v901_v29 }
 0x43f   : > { %v895_v35 = vpop.xlane.xlu0 %894 }
 0x440   : > { %v933_v37 = vmul.f32 0.25, %v895_v35 }
 0x443   : > { %v913_v54 = vpop.xlane.xlu0 %912 }
 0x444   : > { %v939_v55 = vmul.f32 0.25, %v913_v54 }
 0x447   : > { %v907_v63 = vpop.xlane.xlu0 %906 }
 0x448   : > { %v937_v3 = vmul.f32 0.25, %v907_v63 }
 0x455   : > { %897 = vadd.xlane.f32.xlu1 %v896_v20 }
 0x466   : > { %997 = vperm.xlu1 %1336, %v1503_v53  }
 0x46a   : > { %987 = vperm.xlu1 %1336, %v1507_v56  }
 0x46c   : > { %v892_v22 = vpop.xlane.xlu1 %891 }
 0x46d   : > { %v932_v24 = vmul.f32 0.25, %v892_v22 }
 0x46f   : > { %v1044_v25 = vsub.f32 %v1028_v23, %v932_v24 }
 0x470   : > { %v953_v26 = vpop.permute.xlu1 %952 }
 0x471   : > { %1060 = vst.msk [vmem:[%s1545_s23 + $0x18] sm:$0xff] %vm880_vm3, %v1044_v25  ;;  %v1026_v28 = vadd.f32 %v953_v26, %v1489_v44 }
 0x473   : > { %v1042_v31 = vsub.f32 %v1026_v28, %v930_v27 }
 0x474   : > { %v978_v32 = vpop.permute.xlu1 %977 }
 0x475   : > { %1058 = vst.msk [vmem:[%s1545_s23 + $0x8] sm:$0xff] %vm880_vm3, %v1042_v31  ;;  %v1031_v33 = vadd.f32 %v978_v32, %v1493_v46 }
 0x477   : > { %v1047_v34 = vsub.f32 %v1031_v33, %v935_v30 }
 0x478   : > { %v968_v36 = vpop.permute.xlu1 %967 }
 0x479   : > { %1063 = vst.msk [vmem:[%s1545_s23 + $0x30] sm:$0xff] %vm880_vm3, %v1047_v34  ;;  %v1029_v38 = vadd.f32 %v968_v36, %v1499_v50 }
 0x47b   : > { %v1045_v39 = vsub.f32 %v1029_v38, %v933_v37 }
 0x47c   : > { %v983_v42 = vpop.permute.xlu1 %982 }
 0x47d   : > { %1061 = vst.msk [vmem:[%s1545_s23 + $0x20] sm:$0xff] %vm880_vm3, %v1045_v39  ;;  %v1032_v44 = vadd.f32 %v983_v42, %v871_v4 }
 0x48e   : > { %915 = vadd.xlane.f32.xlu1 %v914_v40 }
 0x492   : > { %909 = vadd.xlane.f32.xlu1 %v908_v41 }
 0x4a3   : > { %1007 = vperm.xlu1 %1336, %v1523_v1  }
 0x4ad   : > { %v904_v43 = vpop.xlane.xlu1 %903 }
 0x4ae   : > { %v936_v45 = vmul.f32 0.25, %v904_v43 }
 0x4b0   : > { %v1048_v46 = vsub.f32 %v1032_v44, %v936_v45 }
 0x4b1   : > { %v973_v49 = vpop.permute.xlu1 %972 }
 0x4b2   : > { %1064 = vst.msk [vmem:[%s1545_s23 + $0x38] sm:$0xff] %vm880_vm3, %v1048_v46  ;;  %v1030_v51 = vadd.f32 %v973_v49, %v869_v8  ;;  %v1003_v8 = vpop.permute.xlu0 %1002 }
 0x4b6   : > { %v993_v9 = vpop.permute.xlu0 %992 }
 0x4b7   : > { %v1034_v15 = vadd.f32 %v993_v9, %v1515_v62 }
 0x4ba   : > { %v925_v10 = vpop.xlane.xlu0 %924 }
 0x4bb   : > { %v943_v30 = vmul.f32 0.25, %v925_v10 }
 0x4c7   : > { %927 = vadd.xlane.f32.xlu1 %v926_v47 }
 0x4cb   : > { %921 = vadd.xlane.f32.xlu1 %v920_v48 }
 0x4dc   : > { %1017 = vperm.xlu1 %1336, %v1520_v0  }
 0x4e2   : > { %v898_v50 = vpop.xlane.xlu1 %897 }
 0x4e3   : > { %v934_v52 = vmul.f32 0.25, %v898_v50 }
 0x4e5   : > { %v1046_v57 = vsub.f32 %v1030_v51, %v934_v52 }
 0x4e6   : > { %v998_v58 = vpop.permute.xlu1 %997 }
 0x4e7   : > { %1062 = vst.msk [vmem:[%s1545_s23 + $0x28] sm:$0xff] %vm880_vm3, %v1046_v57  ;;  %v1035_v59 = vadd.f32 %v998_v58, %v1503_v53  ;;  %v1036_v53 = vadd.f32 %v1003_v8, %v1513_v61 }
 0x4e9   : > { %v1051_v60 = vsub.f32 %v1035_v59, %v939_v55 }
 0x4ea   : > { %v988_v2 = vpop.permute.xlu1 %987 }
 0x4eb   : > { %1067 = vst.msk [vmem:[%s1545_s23 + $0x50] sm:$0xff] %vm880_vm3, %v1051_v60  ;;  %v1033_v4 = vadd.f32 %v988_v2, %v1507_v56  ;;  %v919_v56 = vpop.xlane.xlu0 %918 }
 0x4ec   : > { %v941_v17 = vmul.f32 0.25, %v919_v56 }
 0x4ed   : > { %v1049_v7 = vsub.f32 %v1033_v4, %v937_v3 }
 0x4ef   : > { %1065 = vst.msk [vmem:[%s1545_s23 + $0x40] sm:$0xff] %vm880_vm3, %v1049_v7  ;;  %v1013_v61 = vpop.permute.xlu0 %1012 }
 0x4f0   : > { %v1038_v27 = vadd.f32 %v1013_v61, %v1531_v5 }
 0x4f3   : > { %v1023_v23 = vpop.permute.xlu0 %1022 }
 0x4f4   : > { %v1040_v24 = vadd.f32 %v1023_v23, %v1533_v6 }
 0x51b   : > { %v916_v11 = vpop.xlane.xlu1 %915 }
 0x51c   : > { %v940_v12 = vmul.f32 0.25, %v916_v11 }
 0x51e   : > { %v1052_v13 = vsub.f32 %v1036_v53, %v940_v12 }
 0x51f   : > { %v910_v14 = vpop.xlane.xlu1 %909 }
 0x520   : > { %1068 = vst.msk [vmem:[%s1545_s23 + $0x58] sm:$0xff] %vm880_vm3, %v1052_v13  ;;  %v938_v16 = vmul.f32 0.25, %v910_v14 }
 0x522   : > { %v1050_v18 = vsub.f32 %v1034_v15, %v938_v16 }
 0x523   : > { %v1008_v20 = vpop.permute.xlu1 %1007 }
 0x524   : > { %1066 = vst.msk [vmem:[%s1545_s23 + $0x48] sm:$0xff] %vm880_vm3, %v1050_v18  ;;  %v1037_v21 = vadd.f32 %v1008_v20, %v1523_v1 }
 0x526   : > { %v1053_v22 = vsub.f32 %v1037_v21, %v941_v17 }
 0x528   : > { %1069 = vst.msk [vmem:[%s1545_s23 + $0x60] sm:$0xff] %vm880_vm3, %v1053_v22 }
 0x554   : > { %v928_v62 = vpop.xlane.xlu1 %927 }
 0x555   : > { %v944_v19 = vmul.f32 0.25, %v928_v62 }
 0x557   : > { %v1056_v25 = vsub.f32 %v1040_v24, %v944_v19 }
 0x558   : > { %v922_v26 = vpop.xlane.xlu1 %921 }
 0x559   : > { %1072 = vst.msk [vmem:[%s1545_s23 + $0x78] sm:$0xff] %vm880_vm3, %v1056_v25  ;;  %v942_v28 = vmul.f32 0.25, %v922_v26 }
 0x55b   : > { %v1054_v29 = vsub.f32 %v1038_v27, %v942_v28 }
 0x55c   : > { %v1018_v1 = vpop.permute.xlu1 %1017 }
 0x55d   : > { %1070 = vst.msk [vmem:[%s1545_s23 + $0x68] sm:$0xff] %vm880_vm3, %v1054_v29  ;;  %v1039_v31 = vadd.f32 %v1018_v1, %v1520_v0 }
 0x55f   : > { %v1055_v32 = vsub.f32 %v1039_v31, %v943_v30 }
 0x561   : > { %1071 = vst.msk [vmem:[%s1545_s23 + $0x70] sm:$0xff] %vm880_vm3, %v1055_v32 }
 0x562 PF: > { %s13_s12 = sadd.s32 1, %s1353_s12  }
 0x563   : > { %p10_p4 = scmp.ge.s32.totalorder %s13_s12, 4  }
 0x565   :  { %12 = sbr.rel (!%p10_p4) target bundleno = 1 (0x1), region = 68 }

</bundles_post_ra>
